<compile_context>
chip_gen: v5e
topology: v5e:2x2
jax: 0.10.0
libtpu: 0.0.40
codegen_flags: <defaults>
</compile_context>

<pallas_src>
import functools
import math

import jax
import jax.numpy as jnp
from jax.experimental import pallas as pl
from jax.experimental.pallas import tpu as pltpu


def _round_up(x, m):
    return (x + m - 1) // m * m


def _rowsum_kernel(x_ref, out_ref, *, size, need_col_mask):
    """Accumulates lane-folded per-row sums of x across the vocab grid axis.

    out block: (tm, 128) f32, resident in VMEM across the vocab axis.
    """
    j = pl.program_id(1)                      # vocab-tile index (inner axis)

    @pl.when(j == 0)
    def _init():
        out_ref[...] = jnp.zeros_like(out_ref)

    x = x_ref[...].astype(jnp.float32)        # (tm, tv) log-probs
    tm, tv = x.shape

    def _fold_accumulate(xv):
        # Static lane-group fold (tv -> 128): ~1 VPU add / element, then a
        # dense (tm, 128) accumulate into the resident output block.
        acc = xv[:, 0:128]
        for g in range(1, tv // 128):
            acc = acc + xv[:, g * 128:(g + 1) * 128]
        out_ref[...] += acc

    if need_col_mask:
        last_j = pl.num_programs(1) - 1

        @pl.when(j != last_j)
        def _hot():                           # interior tiles: no masking at all
            _fold_accumulate(x)

        @pl.when(j == last_j)
        def _edge():                          # only the edge tile pays the mask
            col = jax.lax.broadcasted_iota(jnp.int32, (tm, tv), 1)
            limit = size - j * tv             # scalar; no per-element +j*tv
            _fold_accumulate(jnp.where(col < limit, x, jnp.float32(0.0)))
    else:
        _fold_accumulate(x)


def _choose_tiles(n, v, itemsize):
    """(sublane,128)-aligned tiles.  x tile capped at ~8 MiB so the
    double-buffered stream fits scoped VMEM on v5e/v6e and v7x's 64 MiB.
    tm is also capped so the parallel row axis has >= ~8 tiles (v7x 2 TCs)."""
    pack = max(8, 32 // max(int(itemsize), 1))      # f32 -> 8, bf16 -> 16
    tv = min(_round_up(v, 128), 2048)
    budget_bytes = 8 * 1024 * 1024
    tm_cap = max(pack, (budget_bytes // (tv * itemsize)) // pack * pack)
    tm_target = _round_up(max(1, -(-n // 8)), pack)  # aim for >= 8 row tiles
    tm = max(pack, min(tm_cap, tm_target, _round_up(n, pack)))
    return tm, tv, pack


def label_smoothing_loss(x, target, *, size, padding_idx, smoothing,
                         tile_rows=None, tile_vocab=None):
    """x: (N, size) log-probs (f32 or bf16), target: (N,) int.
    Returns the scalar KLDivLoss(reduction='sum') against the smoothed
    target distribution, matching the PyTorch LabelSmoothing forward."""
    n, v = x.shape
    assert v == size
    confidence = 1.0 - smoothing
    base = smoothing / (size - 2)

    # Entropy term per valid row: sum_c td*log(td), with 0*log(0) := 0
    # folded at trace time (handles smoothing == 0.0 / 1.0 without NaN).
    ent = 0.0
    if confidence > 0.0:
        ent += confidence * math.log(confidence)
    if base > 0.0:
        ent += (size - 2) * base * math.log(base)

    itemsize = jnp.dtype(x.dtype).itemsize
    auto_tm, auto_tv, pack = _choose_tiles(n, v, itemsize)
    tm = auto_tm if tile_rows is None else _round_up(tile_rows, pack)
    tv = auto_tv if tile_vocab is None else _round_up(tile_vocab, 128)
    assert tm % 8 == 0 and tv % 128 == 0

    grid = (pl.cdiv(n, tm), pl.cdiv(v, tv))
    need_col_mask = (v % tv) != 0

    kernel = functools.partial(_rowsum_kernel, size=size,
                               need_col_mask=need_col_mask)

    partials = pl.pallas_call(
        kernel,
        out_shape=jax.ShapeDtypeStruct((n, 128), jnp.float32),
        grid=grid,
        in_specs=[
            # x streamed tile-by-tile straight from HBM (no host-side pad);
            # Pallas double-buffers it.  (pipeline_mode=pl.Buffered(3) is an
            # optional knob if a profile ever shows exposed DMA.)
            pl.BlockSpec((tm, tv), lambda i, j: (i, j)),
        ],
        # Per-row lane-dense partial sums, resident across the vocab axis;
        # edge-row garbage is clipped at write-back.
        out_specs=pl.BlockSpec((tm, 128), lambda i, j: (i, 0)),
        compiler_params=pltpu.CompilerParams(
            dimension_semantics=("parallel", "arbitrary"),
            vmem_limit_bytes=48 * 1024 * 1024),
    )(x)

    # O(N) post-processing (tiny relative to the N*V stream above).
    row_sum = jnp.sum(partials, axis=1)                              # (N,)
    tgt = target.astype(jnp.int32)
    x_tgt = jnp.take_along_axis(x, tgt[:, None], axis=1)[:, 0].astype(jnp.float32)
    x_pad = x[:, padding_idx].astype(jnp.float32)
    valid = tgt != padding_idx                                       # index_fill_
    per_row = (jnp.float32(ent)
               - jnp.float32(base) * row_sum
               + jnp.float32(base) * x_pad
               - jnp.float32(confidence - base) * x_tgt)
    return jnp.sum(jnp.where(valid, per_row, jnp.float32(0.0)))


def _reference_loss(x, target, *, size, padding_idx, smoothing):
    """Pure-JAX reference mirroring the PyTorch forward."""
    confidence = 1.0 - smoothing
    n, v = x.shape
    col = jnp.arange(v, dtype=jnp.int32)[None, :]
    tgt = target.astype(jnp.int32)[:, None]
    td = jnp.where(col == tgt, confidence, smoothing / (size - 2))
    td = jnp.where(col == padding_idx, 0.0, td)
    td = jnp.where(tgt == padding_idx, 0.0, td)
    safe = jnp.where(td > 0, td, 1.0)
    return jnp.sum(jnp.where(td > 0,
                             td * (jnp.log(safe) - x.astype(jnp.float32)), 0.0))


# TODO(synk): the PyTorch module also caches `self.true_dist` as a side
# effect; only the returned loss is implemented here.

if __name__ == "__main__":
    # Small shapes: N = 20 tokens, vocab size = 200 (non-tile-aligned on
    # purpose so both the row and vocab edge-masking paths are exercised).
    N, SIZE = 20, 200
    PADDING_IDX = 0
    SMOOTHING = 0.1

    key = jax.random.PRNGKey(0)
    kx, kt = jax.random.split(key)
    logits = jax.random.normal(kx, (N, SIZE), dtype=jnp.float32)
    x = jax.nn.log_softmax(logits, axis=-1)          # KLDivLoss input is log-probs
    target = jax.random.randint(kt, (N,), 0, SIZE, dtype=jnp.int32)
    # Force one padded token so the index_fill_ path is exercised.
    target = target.at[3].set(PADDING_IDX)

    ref = _reference_loss(x, target, size=SIZE,
                          padding_idx=PADDING_IDX, smoothing=SMOOTHING)

    # Run 1: forced multi-tile 2-D grid (3 row tiles x 2 vocab tiles) to
    # exercise accumulator residency, edge-column masking and row clipping.
    loss_tiled = label_smoothing_loss(
        x, target, size=SIZE, padding_idx=PADDING_IDX, smoothing=SMOOTHING,
        tile_rows=8, tile_vocab=128)
    loss_tiled = jax.block_until_ready(loss_tiled)
    assert jnp.allclose(loss_tiled, ref, rtol=1e-4, atol=1e-4), (loss_tiled, ref)

    # Run 2: default (auto-chosen) tiles.
    loss_auto = label_smoothing_loss(
        x, target, size=SIZE, padding_idx=PADDING_IDX, smoothing=SMOOTHING)
    loss_auto = jax.block_until_ready(loss_auto)
    assert jnp.allclose(loss_auto, ref, rtol=1e-4, atol=1e-4), (loss_auto, ref)

    # Run 3: degenerate smoothing=0.0 (confidence=1, base=0) stays finite.
    ref0 = _reference_loss(x, target, size=SIZE,
                           padding_idx=PADDING_IDX, smoothing=0.0)
    loss0 = label_smoothing_loss(
        x, target, size=SIZE, padding_idx=PADDING_IDX, smoothing=0.0)
    loss0 = jax.block_until_ready(loss0)
    assert jnp.allclose(loss0, ref0, rtol=1e-4, atol=1e-4), (loss0, ref0)

    # Run 4: bf16 log-probs kept bf16 end-to-end (kernel upcasts in-register,
    # tm auto-rounded to 16 for bf16 sublane packing).
    x_bf16 = x.astype(jnp.bfloat16)
    ref_bf = _reference_loss(x_bf16, target, size=SIZE,
                             padding_idx=PADDING_IDX, smoothing=SMOOTHING)
    loss_bf = label_smoothing_loss(
        x_bf16, target, size=SIZE, padding_idx=PADDING_IDX, smoothing=SMOOTHING)
    loss_bf = jax.block_until_ready(loss_bf)
    assert jnp.allclose(loss_bf, ref_bf, rtol=1e-4, atol=1e-4), (loss_bf, ref_bf)

    print("KERNEL_OK")
</pallas_src>

<mosaic_0001>
module attributes {stable_mosaic.version = 11 : i64} {
  func.func @_rowsum_kernel(%arg0: i32, %arg1: i32, %arg2: memref<8x128xf32, #tpu.memory_space<vmem>>, %arg3: memref<8x128xf32, #tpu.memory_space<vmem>>) attributes {dimension_semantics = [#tpu.dimension_semantics<parallel>, #tpu.dimension_semantics<arbitrary>], iteration_bounds = array<i64: 3, 2>, scalar_prefetch = 0 : i64, scratch_operands = 0 : i64, tpu.core_type = #tpu.core_type<tc>, window_params = [{transform_indices = @transform_0, window_bounds = array<i64: 8, 128>}, {transform_indices = @transform_1, window_bounds = array<i64: 8, 128>}]} {
    %c0_i32 = arith.constant 0 : i32
    %0 = arith.cmpi eq, %arg1, %c0_i32 : i32
    %1 = arith.extui %0 : i1 to i32
    %c0_i32_0 = arith.constant 0 : i32
    %2 = arith.cmpi ne, %1, %c0_i32_0 : i32
    scf.if %2 {
      %cst = arith.constant 0.000000e+00 : f32
      %10 = vector.broadcast %cst : f32 to vector<8x128xf32>
      %c0_5 = arith.constant 0 : index
      %c0_6 = arith.constant 0 : index
      %11 = vector.load %arg3[%c0_5, %c0_6] : memref<8x128xf32, #tpu.memory_space<vmem>>, vector<8x128xf32>
      tpu.vector_store %arg3[%c0_5, %c0_6], %10 {strides = array<i32>} : memref<8x128xf32, #tpu.memory_space<vmem>>, vector<8x128xf32>,
    } else {
    }
    %c0 = arith.constant 0 : index
    %c0_1 = arith.constant 0 : index
    %3 = vector.load %arg2[%c0, %c0_1] : memref<8x128xf32, #tpu.memory_space<vmem>>, vector<8x128xf32>
    %c1_i32 = arith.constant 1 : i32
    %4 = arith.cmpi ne, %arg1, %c1_i32 : i32
    %5 = arith.extui %4 : i1 to i32
    %c0_i32_2 = arith.constant 0 : i32
    %6 = arith.cmpi ne, %5, %c0_i32_2 : i32
    scf.if %6 {
      %c0_5 = arith.constant 0 : index
      %c0_6 = arith.constant 0 : index
      %10 = vector.load %arg3[%c0_5, %c0_6] : memref<8x128xf32, #tpu.memory_space<vmem>>, vector<8x128xf32>
      %11 = arith.addf %10, %3 : vector<8x128xf32>
      %c0_7 = arith.constant 0 : index
      %c0_8 = arith.constant 0 : index
      %12 = vector.load %arg3[%c0_7, %c0_8] : memref<8x128xf32, #tpu.memory_space<vmem>>, vector<8x128xf32>
      tpu.vector_store %arg3[%c0_7, %c0_8], %11 {strides = array<i32>} : memref<8x128xf32, #tpu.memory_space<vmem>>, vector<8x128xf32>,
    } else {
    }
    %c1_i32_3 = arith.constant 1 : i32
    %7 = arith.cmpi eq, %arg1, %c1_i32_3 : i32
    %8 = arith.extui %7 : i1 to i32
    %c0_i32_4 = arith.constant 0 : i32
    %9 = arith.cmpi ne, %8, %c0_i32_4 : i32
    scf.if %9 {
      %10 = tpu.iota {dimensions = array<i32: 1>} : vector<8x128xi32>
      %c128_i32 = arith.constant 128 : i32
      %11 = arith.muli %arg1, %c128_i32 : i32
      %c200_i32 = arith.constant 200 : i32
      %12 = arith.subi %c200_i32, %11 : i32
      %13 = vector.broadcast %12 : i32 to vector<8x128xi32>
      %14 = arith.cmpi slt, %10, %13 : vector<8x128xi32>
      %cst = arith.constant 0.000000e+00 : f32
      %15 = vector.broadcast %cst : f32 to vector<8x128xf32>
      %16 = arith.select %14, %3, %15 : vector<8x128xi1>, vector<8x128xf32>
      %c0_5 = arith.constant 0 : index
      %c0_6 = arith.constant 0 : index
      %17 = vector.load %arg3[%c0_5, %c0_6] : memref<8x128xf32, #tpu.memory_space<vmem>>, vector<8x128xf32>
      %18 = arith.addf %17, %16 : vector<8x128xf32>
      %c0_7 = arith.constant 0 : index
      %c0_8 = arith.constant 0 : index
      %19 = vector.load %arg3[%c0_7, %c0_8] : memref<8x128xf32, #tpu.memory_space<vmem>>, vector<8x128xf32>
      tpu.vector_store %arg3[%c0_7, %c0_8], %18 {strides = array<i32>} : memref<8x128xf32, #tpu.memory_space<vmem>>, vector<8x128xf32>,
    } else {
    }
    return
  }
  func.func @transform_0(%arg0: i32, %arg1: i32) -> (i32, i32) {
    %c0_i32 = arith.constant 0 : i32
    return %arg0, %arg1 : i32, i32
  }
  func.func @transform_1(%arg0: i32, %arg1: i32) -> (i32, i32) {
    %c0_i32 = arith.constant 0 : i32
    %c0_i32_0 = arith.constant 0 : i32
    return %arg0, %c0_i32 : i32, i32
  }
}

</mosaic_0001>

<bundles_post_ra>
// kernel: tpu_custom_call.1
= control target key start
LH: loop header
LB: loop body
LE: loop exit
PB: predicated region body
PF: predicated region fallthrough
CT: control target
= control target key end

     0   :  { %6 = vsyncpa [#allocation3], 0  ;;  %s744_s0 = inlined_call_operand.hbm [shape: f32[20,200], index: 0, kind: input, shape index: {}]   ;;  %s745_s1 = inlined_call_operand.hbm [shape: f32[20,128], index: 1, kind: output, shape index: {}]  }
   0x1   :  { %8 = vsyncpa [#allocation3 + $0x1], 0 }
   0x2   :  { %9 = vsyncpa [#allocation4], 0 }
   0x3   :  { %11 = vsyncpa [#allocation4 + $0x1], 0  ;;  %s562_s6 = smov 0   ;;  %s564_s7 = smov 0  }
   0x4   :  { %s566_s8 = smov 0   ;;  %s568_s9 = smov 0  }
   0x5   :  { %s570_s10 = smov 0   ;;  %s572_s11 = smov 0  }
   0x6   :  { %s574_s12 = smov 0   ;;  %s576_s13 = smov 0  }
   0x7   :  { %s578_s14 = smov 0   ;;  %s580_s15 = smov 0  }
   0x8   :  { %s582_s16 = smov 0  }
   0x9 LB: > { %s276_s17 = sadd.s32 4294967295, %s549_s16   ;;  %s277_s18 = sadd.s32 4294967294, %s549_s16   ;;  %s549_s16 = sphi %s582_s16, %s17_s16   ;;  %s545_s15 = sphi %s580_s15, %s762_s15   ;;  %s541_s14 = sphi %s578_s14, %s761_s14   ;;  %s537_s13 = sphi %s576_s13, %s760_s13   ;;  %s533_s12 = sphi %s574_s12, %s759_s12   ;;  %s529_s11 = sphi %s572_s11, %s758_s11   ;;  %s525_s10 = sphi %s570_s10, %s757_s10   ;;  %s521_s9 = sphi %s568_s9, %s756_s9   ;;  %s517_s8 = sphi %s566_s8, %s755_s8   ;;  %s513_s7 = sphi %s564_s7, %s754_s7   ;;  %s509_s6 = sphi %s562_s6, %s753_s6  }
   0xa   : > { %s26_s19 = sadd.s32 1, %s541_s14  ;;  %s29_s20 = sadd.s32 1, %s545_s15 }
   0xb   : > { %p27_p0 = scmp.ge.s32.totalorder %s26_s19, 2  ;;  %s38_s21 = sadd.s32 1, %s529_s11 }
   0xc   : > { %p45_p1 = scmp.ne.s32.totalorder %s529_s11, %s525_s10  ;;  %p46_p2 = scmp.eq.s32.totalorder %s549_s16, 0 }
   0xd   : > { %s764_s19 = smov (%p27_p0, %s26_s19), 0  ;;  %s766_s20 = smov (!%p27_p0, %s29_s20), %s545_s15 }
   0xe   : > { %s34_s22 = ssub.s32 %s541_s14, %s764_s19  ;;  %p628_p3 = por %p46_p2, %p45_p1 }
   0xf   : > { %p31_p4 = scmp.ge.s32.totalorder %s766_s20, 3  ;;  %p51_p5 = scmp.ne.s32.totalorder %s525_s10, %s521_s9 }
  0x10   : > { %p52_p6 = scmp.eq.s32.totalorder %s276_s17, 0  ;;  %s64_s24 = sadd.s32 1, %s517_s8 }
  0x11   : > { %s768_s20 = smov (%p31_p4, %s766_s20), 0  ;;  %p74_p8 = scmp.ne.s32.totalorder %s517_s8, %s513_s7 }
  0x12   : > { %748 = sst [smem:[#allocation8_spill]] %s768_s20  ;;  %p636_p7 = por %p52_p6, %p51_p5 }
  0x13   : > { %s33_s26 = ssub.s32 %s545_s15, %s768_s20  ;;  %p75_p9 = scmp.eq.s32.totalorder %s276_s17, 5 }
  0x14   : > { %s35_s27 = sor.u32 %s34_s22, %s33_s26  ;;  %p62_p10 = scmp.eq.s32.totalorder %s33_s26, 0 }
  0x15   : > { %p36_p11 = scmp.eq.s32.totalorder %s35_s27, 0  ;;  %p644_p12 = por %p75_p9, %p74_p8 }
  0x16   : > { %s649_s29 = scalar_select %p62_p10, %s517_s8, %s64_s24  }
  0x17   : > { %s652_s30 = scalar_select %p36_p11, %s529_s11, %s38_s21  }
  0x18   : > { %p80_p13 = scmp.ne.s32.totalorder %s513_s7, %s509_s6  ;;  %p81_p0 = scmp.eq.s32.totalorder %s277_s18, 5 }
  0x19   : > { %p306_p1 = scmp.lt.s32.totalorder %s549_s16, 6  ;;  %s101_s3 = sand.u32 1, %s529_s11  }
  0x1a   : > { %p657_p2 = por %p81_p0, %p80_p13  ;;  %s280_s4 = sshll.u32 %s101_s3, 3 }
  0x1b   : > { %s281_s5 = sshll.u32 %s545_s15, 1  ;;  %s105_s17 = scalar_lea.vmem [#allocation2], %s280_s4 }
  0x1c   : > { %s109_s9 = sadd.s32 %s541_s14, %s281_s5  ;;  %s115_s22 = sshll.u32 %s105_s17, 4  ;;  %s116_s22 = int_to_ptr.vmem [resolvable:$true] %s115_s22 }
  0x1d   : > { %s282_s26 = sshll.u32 %s109_s9, 3  ;;  %p299_p4 = pnand %p306_p1, %p628_p3 }
  0x1e   : > { %s111_s27 = scalar_lea.hbm %s744_s0, %s282_s26  ;;  %p283_p5 = scmp.ge.s32.totalorder %s549_s16, 1 }
  0x1f   : > { %s113_s18 = sshll.u32 %s111_s27, 4  ;;  %s102_s20 = scalar_lea.sflag [#allocation3], %s101_s3  ;;  %s114_s18 = int_to_ptr.hbm [resolvable:$true] %s113_s18 }
  0x20   : > { %301 = dma.hbm_to_vmem [thread:$0]  (!%p299_p4), %s114_s18, 128, %s116_s22, %s102_s20  }
  0x21   : > { %p120_p6 = scmp.lt.s32.totalorder %s549_s16, 7 }
  0x23   : > { %p121_p8 = pnand %p283_p5, %p120_p6 }
  0x24   : > { %s126_s4 = sand.u32 (!%p121_p8), 1, %s525_s10  }
  0x25   : > { %124 = sbr.rel (%p121_p8) target bundleno = 94 (0x5e), region = 24  ;;  %s284_s5 = sshll.u32 (!%p121_p8), %s126_s4, 3 }
  0x26   : > { %s127_s9 = scalar_lea.sflag (!%p121_p8), [#allocation3], %s126_s4  ;;  %s130_s17 = scalar_lea.vmem (!%p121_p8), [#allocation2], %s284_s5 }
  0x2a   : > { %500 = dma.done.wait (%p636_p7), %s127_s9, 128  }
  0x2b   : > { %502 = vsyncadd (%p636_p7), %s127_s9, 4294967168  ;;  %s147_s23 = sand.u32 1, %s513_s7   ;;  %p286_p3 = scmp.ne.s32.totalorder %s533_s12, 0 }
  0x2c   : > { %s285_s3 = sshll.u32 %s147_s23, 3 }
  0x2d   : > { %s679_s20 = scalar_lea.vmem [#allocation5], %s285_s3  ;;  %153 = sbr.rel (%p286_p3) target bundleno = 52 (0x34), region = 32 }
  0x32   : > { %v551_v0 = vmov 0.0  }
  0x33   : > { %154 = vst [vmem:[%s679_s20] sm:$0xff] %v551_v0 }
  0x34 PF: > { %v155_v1 = vld [vmem:[%s130_s17] sm:$0xff]  ;;  %p287_p9 = scmp.eq.s32.totalorder %s533_s12, 1 }
  0x36   : > { %159 = sbr.rel (%p287_p9) target bundleno = 63 (0x3f), region = 36 }
  0x3b   : > { %v160_v2 = vld [vmem:[%s679_s20] sm:$0xff] }
  0x3c   : > { %v161_v3 = vadd.f32 %v160_v2, %v155_v1 }
  0x3e   : > { %162 = vst [vmem:[%s679_s20] sm:$0xff] %v161_v3 }
  0x3f PF: > { %p288_p7 = scmp.ne.s32.totalorder %s533_s12, 1 }
  0x40   : > { %s289_s25 = sshll.u32 (!%p288_p7), %s533_s12, 7 }
  0x41   : > { %166 = sbr.rel (%p288_p7) target bundleno = 79 (0x4f), region = 40  ;;  %s170_s22 = ssub.s32 (!%p288_p7), 200, %s289_s25 }
  0x46   : > { %v167_v4 = vlaneseq  ;;  %v171_v6 = vstv %s170_s22  ;;  %v174_v7 = vld [vmem:[%s679_s20] sm:$0xff] }
  0x48   : > { %v168_v5 = vand.u32 127, %v167_v4 }
  0x4a   : > { %vm172_vm0 = vcmp.lt.s32.totalorder %v168_v5, %v171_v6 }
  0x4b   : > { %v173_v8 = vsel %vm172_vm0, %v155_v1, 0.0 }
  0x4c   : > { %v175_v9 = vadd.f32 %v174_v7, %v173_v8 }
  0x4e   : > { %176 = vst [vmem:[%s679_s20] sm:$0xff] %v175_v9 }
  0x4f PF: > { %s291_s26 = sshll.u32 %s537_s13, 3  ;;  %s190_s18 = sshll.u32 %s679_s20, 4  ;;  %s191_s18 = int_to_ptr.vmem [resolvable:$true] %s190_s18 }
  0x50   : > { %s188_s27 = scalar_lea.hbm %s745_s1, %s291_s26  ;;  %s178_s4 = scalar_lea.sflag [#allocation4], %s147_s23 }
  0x51   : > { %s192_s12 = sshll.u32 %s188_s27, 4  ;;  %s447_s13 = scalar_lea.hbm %s745_s1, 24  ;;  %s193_s12 = int_to_ptr.hbm [resolvable:$true] %s192_s12 }
  0x52   : > { %s441_s5 = sshra.s32 %s193_s12, 4  ;;  %s442_s5 = int_to_ptr.hbm [resolvable:$true] %s441_s5 }
  0x53   : > { %s443_s9 = scalar_lea.hbm %s442_s5, 8  ;;  %p448_p0 = scmp.lt.s32.totalorder %s442_s5, %s745_s1 }
  0x54   : > { %p444_p10 = scmp.ne.s32.totalorder %s442_s5, %s443_s9  ;;  %p449_p1 = scmp.lt.s32.totalorder %s447_s13, %s443_s9 }
  0x56   : > { %p445_p11 = pnand %p444_p10, %p644_p12  ;;  %p450_p4 = por %p449_p1, %p448_p0 }
  0x58   : > { %p446_p13 = pneg %p445_p11 }
  0x5a   : > { %p451_p5 = pnand %p450_p4, %p446_p13 }
  0x5c   : > { %454 = shalt.err (!%p451_p5)
}
  0x5d   : > { %296 = dma.vmem_to_hbm [thread:$0]  (%p644_p12), %s191_s18, 128, %s193_s12, %s178_s4  }
  0x5e PF: > { %p307_p6 = scmp.ge.s32.totalorder %s549_s16, 2  ;;  %s204_s23 = sand.u32 1, %s509_s6  }
  0x5f   : > { %s205_s20 = scalar_lea.sflag [#allocation4], %s204_s23 }
  0x60   : > { %p303_p8 = pnand %p307_p6, %p657_p2 }
  0x62   : > { %p304_p3 = pneg %p303_p8 }
  0x64   : > { %504 = dma.done.wait (%p304_p3), %s205_s20, 128  }
  0x65   : > { %506 = vsyncadd (%p304_p3), %s205_s20, 4294967168  ;;  %s17_s16 = sadd.s32 1, %s549_s16   ;;  %s752_s28 = sld [smem:[#allocation8_spill]] }
  0x66   : > { %p14_p9 = scmp.ge.s32.totalorder %s17_s16, 8   ;;  %s753_s6 = smov %s513_s7 }
  0x67   : > { %s754_s7 = smov %s517_s8  ;;  %s755_s8 = smov %s649_s29 }
  0x68   : > { %s756_s9 = smov %s525_s10  ;;  %s757_s10 = smov %s529_s11 }
  0x69   : > { %s758_s11 = smov %s652_s30  ;;  %s759_s12 = smov %s541_s14 }
  0x6a   : > { %s760_s13 = smov %s545_s15  ;;  %s761_s14 = smov %s764_s19 }
  0x6b   : > { %s762_s15 = smov %s752_s28  ;;  %16 = sbr.rel (!%p14_p9) target bundleno = 9 (0x9), region = 81 }
  0x70   :  { %211 = vsyncpa [#allocation3], 1 }
  0x71   :  { %213 = vsyncpa [#allocation3 + $0x1], 1 }
  0x72   :  { %214 = vsyncpa [#allocation4], 1 }
  0x73   :  { %216 = vsyncpa [#allocation4 + $0x1], 1 }

</bundles_post_ra>
